<compile_context>
chip_gen: v7x
topology: tpu7x:2x2x1
jax: 0.10.0
libtpu: 0.0.40
codegen_flags: <defaults>
</compile_context>

<pallas_src>
import functools

import jax
import jax.numpy as jnp
from jax import lax
from jax.experimental import pallas as pl
from jax.experimental.pallas import tpu as pltpu


def _pick_batch_tile(b, n, heads, *, max_rows=1024, max_fold_rows=512):
    """Pick the batch-tile size b_tile.

    - b_tile * n capped at `max_rows` (MXU M-fill; tiny at dim=32, fits every
      generation's VMEM including v7x's 64 MiB).
    - If the head-folded scores path is viable (heads*n <= max_fold_rows), cap
      b_tile*heads*n at max_fold_rows so the (R, R) scores tile stays small.
    - Keep >= 2 grid steps when b >= 2 so the "parallel" batch axis can shard
      across v7x's two TensorCores.
    Prefers an exact divisor of b; otherwise the wrapper pads the batch.
    """
    cap = max(1, min(b, max_rows // max(n, 1)))
    if heads * n <= max_fold_rows:
        cap = min(cap, max(1, max_fold_rows // (heads * n)))
    if b >= 2:
        cap = min(cap, -(-b // 2))          # ceil(b/2) -> at least 2 grid steps
    cap = max(1, min(cap, b))
    best_div = max(d for d in range(1, cap + 1) if b % d == 0)
    if 2 * best_div >= cap:
        return best_div                      # exact divisor, no padding needed
    return cap                               # pad the batch instead of M-collapse


def _attention_kernel(x_ref, wqkv_ref, wo_ref, bo_ref, o_ref, *,
                      b_tile, n, heads, dim_head, inner_dim, fold_heads,
                      compute_dtype):
    # x_ref:    (1, b_tile*n, dim)   packed batch tile, rows ordered (b, n)
    # wqkv_ref: (dim, 3*inner_dim)   fused [q*scale | k | v] weight (bf16)
    # wo_ref:   (inner_dim, dim)     output projection weight (bf16)
    # bo_ref:   (1, dim)             output projection bias (f32)
    # o_ref:    fold path  -> (1, b_tile, n*dim)   lane-dense slab
    #           fallback   -> (b_tile, n, dim)
    dim = x_ref.shape[-1]
    m = b_tile * n

    # ---- fused QKV projection over the whole packed tile (one MXU matmul) ----
    x2 = x_ref[...].reshape(m, dim).astype(compute_dtype)
    qkv = jnp.dot(x2, wqkv_ref[...],
                  preferred_element_type=jnp.float32).astype(compute_dtype)

    if fold_heads:
        # Fold batch*heads into the row dimension: one block-masked scores
        # matmul and one PV matmul.  Row order (b, i, h) makes the stacking a
        # pure reshape and the PV result lands back in the (m, h*d) layout.
        r = m * heads
        qs = qkv[:, 0 * inner_dim:1 * inner_dim].reshape(r, dim_head)
        ks = qkv[:, 1 * inner_dim:2 * inner_dim].reshape(r, dim_head)
        vs = qkv[:, 2 * inner_dim:3 * inner_dim].reshape(r, dim_head)

        # scores: contract the minor dim directly (no explicit k.T relayout)
        s = lax.dot_general(qs, ks, (((1,), (1,)), ((), ())),
                            preferred_element_type=jnp.float32)       # (r, r)

        # block-diagonal mask: row (b, i, h) may only attend to cols (b, j, h)
        ri = lax.broadcasted_iota(jnp.int32, (r, 1), 0)
        ci = lax.broadcasted_iota(jnp.int32, (1, r), 1)
        gi = (ri // (n * heads)) * heads + (ri % heads)
        gj = (ci // (n * heads)) * heads + (ci % heads)
        s = jnp.where(gi == gj, s, -jnp.inf)

        # numerically stable softmax in f32 (VPU + EUP)
        s = s - jnp.max(s, axis=-1, keepdims=True)
        p = jnp.exp(s)
        p = p * pl.reciprocal(jnp.sum(p, axis=-1, keepdims=True), approx=True)

        oh = jnp.dot(p.astype(compute_dtype), vs,
                     preferred_element_type=jnp.float32)              # (r, d)
        att = oh.astype(compute_dtype).reshape(m, inner_dim)
        y = jnp.dot(att, wo_ref[...],
                    preferred_element_type=jnp.float32) + bo_ref[...]  # (m, dim)
        # single lane-dense store of the whole packed block
        o_ref[...] = y.reshape(1, b_tile, n * dim).astype(o_ref.dtype)
    else:
        # Per-head fallback (long sequences): batched einsums per head, output
        # projection accumulated per head in f32 registers (no concat scratch).
        # TODO(synk): replace with a flash-style KV-tiled online softmax.
        q3 = qkv[:, 0 * inner_dim:1 * inner_dim].reshape(b_tile, n, inner_dim)
        k3 = qkv[:, 1 * inner_dim:2 * inner_dim].reshape(b_tile, n, inner_dim)
        v3 = qkv[:, 2 * inner_dim:3 * inner_dim].reshape(b_tile, n, inner_dim)
        y = jnp.zeros((m, dim), jnp.float32) + bo_ref[...]
        for h in range(heads):
            lo = h * dim_head
            qh = q3[:, :, lo:lo + dim_head]
            kh = k3[:, :, lo:lo + dim_head]
            vh = v3[:, :, lo:lo + dim_head]
            s = jnp.einsum('bqd,bkd->bqk', qh, kh,
                           preferred_element_type=jnp.float32)
            s = s - jnp.max(s, axis=-1, keepdims=True)
            p = jnp.exp(s)
            p = p * pl.reciprocal(jnp.sum(p, axis=-1, keepdims=True),
                                  approx=True)
            oh = jnp.einsum('bqk,bkd->bqd', p.astype(compute_dtype), vh,
                            preferred_element_type=jnp.float32)       # (bt,n,d)
            y = y + jnp.dot(oh.reshape(m, dim_head).astype(compute_dtype),
                            wo_ref[lo:lo + dim_head, :],
                            preferred_element_type=jnp.float32)
        o_ref[...] = y.reshape(b_tile, n, dim).astype(o_ref.dtype)


def attention_pallas(x, wq, wk, wv, wo, bo, *, heads, dim_head,
                     compute_dtype=jnp.bfloat16):
    b, n, dim = x.shape
    inner_dim = heads * dim_head
    scale = dim_head ** (-0.5)
    out_dtype = x.dtype

    # One-time wrapper prep (pure JAX): fold the softmax scale into the q
    # columns (dots are linear in q), fuse the three projections into a single
    # MXU operand, and cast matmul weights to bf16 (f32 accumulation in-kernel).
    w_qkv = jnp.concatenate([wq * scale, wk, wv], axis=1).astype(compute_dtype)
    wo_c = wo.astype(compute_dtype)
    bo2 = bo.reshape(1, dim).astype(jnp.float32)

    b_tile = _pick_batch_tile(b, n, heads)
    num_tiles = -(-b // b_tile)
    b_pad = num_tiles * b_tile
    x_p = jnp.pad(x, ((0, b_pad - b), (0, 0), (0, 0))) if b_pad != b else x
    # Pack each batch tile into a single leading-axis block -> one DMA and one
    # (b_tile*n, dim) MXU slab per grid step (contiguous reshape, free in XLA).
    x_packed = x_p.reshape(num_tiles, b_tile * n, dim)

    grid = (num_tiles,)
    in_specs = [
        pl.BlockSpec((1, b_tile * n, dim), lambda i: (i, 0, 0)),
        pl.BlockSpec((dim, 3 * inner_dim), lambda i: (0, 0)),
        pl.BlockSpec((inner_dim, dim), lambda i: (0, 0)),
        pl.BlockSpec((1, dim), lambda i: (0, 0)),
    ]
    cparams = pltpu.CompilerParams(dimension_semantics=("parallel",))

    def build(fold):
        kernel = functools.partial(
            _attention_kernel, b_tile=b_tile, n=n, heads=heads,
            dim_head=dim_head, inner_dim=inner_dim, fold_heads=fold,
            compute_dtype=compute_dtype)
        if fold:
            out_shape = jax.ShapeDtypeStruct((num_tiles, b_tile, n * dim),
                                             out_dtype)
            out_spec = pl.BlockSpec((1, b_tile, n * dim), lambda i: (i, 0, 0))
        else:
            out_shape = jax.ShapeDtypeStruct((b_pad, n, dim), out_dtype)
            out_spec = pl.BlockSpec((b_tile, n, dim), lambda i: (i, 0, 0))
        return pl.pallas_call(
            kernel,
            out_shape=out_shape,
            grid_spec=pltpu.PrefetchScalarGridSpec(
                num_scalar_prefetch=0, grid=grid,
                in_specs=in_specs, out_specs=out_spec),
            compiler_params=cparams,
        )

    fold_ok = b_tile * heads * n <= 512
    if fold_ok:
        try:
            out = build(True)(x_packed, w_qkv, wo_c, bo2)
            return out.reshape(b_pad, n, dim)[:b]
        except Exception:
            # Lowering safety net: retry with the per-head path if the folded
            # (reshape-heavy) layout is rejected on this jax/libtpu version.
            pass
    out = build(False)(x_packed, w_qkv, wo_c, bo2)
    return out[:b]


def attention_reference(x, wq, wk, wv, wo, bo, *, heads, dim_head):
    b, n, dim = x.shape
    scale = dim_head ** (-0.5)
    q = x @ wq
    k = x @ wk
    v = x @ wv

    def split_heads(t):  # (b, n, h*d) -> (b, h, n, d)
        return t.reshape(b, n, heads, dim_head).transpose(0, 2, 1, 3)

    q, k, v = map(split_heads, (q, k, v))
    dots = jnp.einsum('bhid,bhjd->bhij', q, k) * scale
    attn = jax.nn.softmax(dots, axis=-1)
    out = jnp.einsum('bhij,bhjd->bhid', attn, v)
    out = out.transpose(0, 2, 1, 3).reshape(b, n, heads * dim_head)
    return out @ wo + bo


def _run_case(key, *, b, n, dim, heads, dim_head, label):
    inner_dim = heads * dim_head
    kx, kqkv, kwo, kbo = jax.random.split(key, 4)

    x = jax.random.normal(kx, (b, n, dim), dtype=jnp.float32)
    # to_qkv: Linear(dim, inner_dim*3, bias=False), stored in (in, out) matmul
    # form; chunk(3, dim=-1): first inner_dim cols -> q, next -> k, last -> v.
    w_qkv_full = jax.random.normal(kqkv, (dim, 3 * inner_dim),
                                   dtype=jnp.float32) * 0.02
    wq = w_qkv_full[:, 0 * inner_dim:1 * inner_dim]
    wk = w_qkv_full[:, 1 * inner_dim:2 * inner_dim]
    wv = w_qkv_full[:, 2 * inner_dim:3 * inner_dim]
    # to_out: Linear(inner_dim, dim) with bias; Dropout(0.0) is identity.
    wo = jax.random.normal(kwo, (inner_dim, dim), dtype=jnp.float32) * 0.02
    bo = jax.random.normal(kbo, (dim,), dtype=jnp.float32) * 0.02

    out = attention_pallas(x, wq, wk, wv, wo, bo, heads=heads,
                           dim_head=dim_head)
    out = jax.block_until_ready(out)
    ref = attention_reference(x, wq, wk, wv, wo, bo, heads=heads,
                              dim_head=dim_head)
    assert out.shape == (b, n, dim), label
    # bf16 MXU operands + approx reciprocal -> loosened tolerance.
    err = jnp.max(jnp.abs(out - ref))
    assert jnp.allclose(out, ref, atol=2e-2, rtol=2e-2), \
        f"{label}: max abs err {err}"


if __name__ == "__main__":
    key = jax.random.PRNGKey(0)
    k0, k1, k2 = jax.random.split(key, 3)

    # Primary shapes consistent with the module defaults:
    # batch=2, seq=8, dim=32, heads=4, dim_head=64 -> inner_dim=256.
    _run_case(k0, b=2, n=8, dim=32, heads=4, dim_head=64, label="primary")
    # Awkward batch: exercises batch padding + a 2-step grid (fold path).
    _run_case(k1, b=7, n=8, dim=32, heads=4, dim_head=64, label="padded-batch")
    # Longer sequence: exercises the per-head fallback path.
    _run_case(k2, b=2, n=160, dim=32, heads=4, dim_head=64, label="per-head")

    print("KERNEL_OK")
</pallas_src>

<mosaic_0001>
module attributes {stable_mosaic.version = 11 : i64} {
  func.func @_attention_kernel(%arg0: i32, %arg1: memref<1x8x32xf32, #tpu.memory_space<vmem>>, %arg2: memref<32x768xbf16, #tpu.memory_space<vmem>>, %arg3: memref<256x32xbf16, #tpu.memory_space<vmem>>, %arg4: memref<1x32xf32, #tpu.memory_space<vmem>>, %arg5: memref<1x8x32xf32, #tpu.memory_space<vmem>>) attributes {dimension_semantics = [#tpu.dimension_semantics<parallel>], iteration_bounds = array<i64: 2>, scalar_prefetch = 0 : i64, scratch_operands = 0 : i64, tpu.core_type = #tpu.core_type<tc>, window_params = [{transform_indices = @transform_0, window_bounds = array<i64: 1, 8, 32>}, {pipeline_mode = #tpu.pipeline_mode<synchronous>, transform_indices = @transform_1, window_bounds = array<i64: 32, 768>}, {pipeline_mode = #tpu.pipeline_mode<synchronous>, transform_indices = @transform_2, window_bounds = array<i64: 256, 32>}, {pipeline_mode = #tpu.pipeline_mode<synchronous>, transform_indices = @transform_3, window_bounds = array<i64: 1, 32>}, {transform_indices = @transform_4, window_bounds = array<i64: 1, 8, 32>}]} {
    %c0 = arith.constant 0 : index
    %c0_0 = arith.constant 0 : index
    %c0_1 = arith.constant 0 : index
    %0 = vector.load %arg1[%c0, %c0_0, %c0_1] : memref<1x8x32xf32, #tpu.memory_space<vmem>>, vector<1x8x32xf32>
    %1 = vector.shape_cast %0 : vector<1x8x32xf32> to vector<8x32xf32>
    %2 = arith.truncf %1 : vector<8x32xf32> to vector<8x32xbf16>
    %c0_2 = arith.constant 0 : index
    %c0_3 = arith.constant 0 : index
    %3 = vector.load %arg2[%c0_2, %c0_3] : memref<32x768xbf16, #tpu.memory_space<vmem>>, vector<32x768xbf16>
    %cst = arith.constant dense<0.000000e+00> : vector<8x768xf32>
    %4 = tpu.matmul %2, %3, %cst {dimension_numbers = #tpu.dot_dimension_numbers<[1], [0], [0], [1], [0, 0, 1, 1], [], []>} : vector<8x32xbf16>, vector<32x768xbf16>, vector<8x768xf32> -> vector<8x768xf32>
    %5 = arith.truncf %4 : vector<8x768xf32> to vector<8x768xbf16>
    %6 = vector.extract_strided_slice %5 {offsets = [0, 0], sizes = [8, 256], strides = [1, 1]} : vector<8x768xbf16> to vector<8x256xbf16>
    %7 = vector.shape_cast %6 : vector<8x256xbf16> to vector<1x8x256xbf16>
    %8 = vector.extract_strided_slice %5 {offsets = [0, 256], sizes = [8, 256], strides = [1, 1]} : vector<8x768xbf16> to vector<8x256xbf16>
    %9 = vector.shape_cast %8 : vector<8x256xbf16> to vector<1x8x256xbf16>
    %10 = vector.extract_strided_slice %5 {offsets = [0, 512], sizes = [8, 256], strides = [1, 1]} : vector<8x768xbf16> to vector<8x256xbf16>
    %11 = vector.shape_cast %10 : vector<8x256xbf16> to vector<1x8x256xbf16>
    %cst_4 = arith.constant 0.000000e+00 : f32
    %12 = vector.broadcast %cst_4 : f32 to vector<8x32xf32>
    %c0_5 = arith.constant 0 : index
    %c0_6 = arith.constant 0 : index
    %13 = vector.load %arg4[%c0_5, %c0_6] : memref<1x32xf32, #tpu.memory_space<vmem>>, vector<1x32xf32>
    %14 = vector.broadcast %13 : vector<1x32xf32> to vector<8x32xf32>
    %15 = arith.addf %12, %14 : vector<8x32xf32>
    %16 = vector.extract_strided_slice %7 {offsets = [0, 0, 0], sizes = [1, 8, 64], strides = [1, 1, 1]} : vector<1x8x256xbf16> to vector<1x8x64xbf16>
    %17 = vector.extract_strided_slice %9 {offsets = [0, 0, 0], sizes = [1, 8, 64], strides = [1, 1, 1]} : vector<1x8x256xbf16> to vector<1x8x64xbf16>
    %18 = vector.extract_strided_slice %11 {offsets = [0, 0, 0], sizes = [1, 8, 64], strides = [1, 1, 1]} : vector<1x8x256xbf16> to vector<1x8x64xbf16>
    "tpu.trace_start"() <{level = 10 : i32, message = "bqd,bkd->bqk"}> : () -> ()
    %cst_7 = arith.constant dense<0.000000e+00> : vector<1x8x8xf32>
    %19 = tpu.matmul %16, %17, %cst_7 {dimension_numbers = #tpu.dot_dimension_numbers<[2], [2], [1], [1], [0, 0, 0, 1, 1, 1], [0], [0]>} : vector<1x8x64xbf16>, vector<1x8x64xbf16>, vector<1x8x8xf32> -> vector<1x8x8xf32>
    "tpu.trace_stop"() : () -> ()
    %cst_8 = arith.constant dense<0xFF800000> : vector<1x8xf32>
    %20 = vector.multi_reduction <maximumf>, %19, %cst_8 [2] : vector<1x8x8xf32> to vector<1x8xf32>
    %21 = vector.shape_cast %20 : vector<1x8xf32> to vector<1x8x1xf32>
    %22 = vector.broadcast %21 : vector<1x8x1xf32> to vector<1x8x8xf32>
    %23 = arith.subf %19, %22 : vector<1x8x8xf32>
    %24 = math.exp %23 : vector<1x8x8xf32>
    %cst_9 = arith.constant dense<0.000000e+00> : vector<1x8xf32>
    %25 = vector.multi_reduction <add>, %24, %cst_9 [2] : vector<1x8x8xf32> to vector<1x8xf32>
    %26 = vector.shape_cast %25 : vector<1x8xf32> to vector<1x8x1xf32>
    %27 = tpu.reciprocal %26 {approx = true} : vector<1x8x1xf32> -> vector<1x8x1xf32>
    %28 = vector.broadcast %27 : vector<1x8x1xf32> to vector<1x8x8xf32>
    %29 = arith.mulf %24, %28 : vector<1x8x8xf32>
    %30 = arith.truncf %29 : vector<1x8x8xf32> to vector<1x8x8xbf16>
    "tpu.trace_start"() <{level = 10 : i32, message = "bqk,bkd->bqd"}> : () -> ()
    %cst_10 = arith.constant dense<0.000000e+00> : vector<1x8x64xf32>
    %31 = tpu.matmul %30, %18, %cst_10 {dimension_numbers = #tpu.dot_dimension_numbers<[2], [1], [1], [2], [0, 0, 0, 1, 1, 2], [0], [0]>} : vector<1x8x8xbf16>, vector<1x8x64xbf16>, vector<1x8x64xf32> -> vector<1x8x64xf32>
    "tpu.trace_stop"() : () -> ()
    %32 = vector.shape_cast %31 : vector<1x8x64xf32> to vector<8x64xf32>
    %33 = arith.truncf %32 : vector<8x64xf32> to vector<8x64xbf16>
    %c0_11 = arith.constant 0 : index
    %c0_12 = arith.constant 0 : index
    %34 = vector.load %arg3[%c0_11, %c0_12] : memref<256x32xbf16, #tpu.memory_space<vmem>>, vector<64x32xbf16>
    %cst_13 = arith.constant dense<0.000000e+00> : vector<8x32xf32>
    %35 = tpu.matmul %33, %34, %cst_13 {dimension_numbers = #tpu.dot_dimension_numbers<[1], [0], [0], [1], [0, 0, 1, 1], [], []>} : vector<8x64xbf16>, vector<64x32xbf16>, vector<8x32xf32> -> vector<8x32xf32>
    %36 = arith.addf %15, %35 : vector<8x32xf32>
    %37 = vector.extract_strided_slice %7 {offsets = [0, 0, 64], sizes = [1, 8, 64], strides = [1, 1, 1]} : vector<1x8x256xbf16> to vector<1x8x64xbf16>
    %38 = vector.extract_strided_slice %9 {offsets = [0, 0, 64], sizes = [1, 8, 64], strides = [1, 1, 1]} : vector<1x8x256xbf16> to vector<1x8x64xbf16>
    %39 = vector.extract_strided_slice %11 {offsets = [0, 0, 64], sizes = [1, 8, 64], strides = [1, 1, 1]} : vector<1x8x256xbf16> to vector<1x8x64xbf16>
    "tpu.trace_start"() <{level = 10 : i32, message = "bqd,bkd->bqk"}> : () -> ()
    %cst_14 = arith.constant dense<0.000000e+00> : vector<1x8x8xf32>
    %40 = tpu.matmul %37, %38, %cst_14 {dimension_numbers = #tpu.dot_dimension_numbers<[2], [2], [1], [1], [0, 0, 0, 1, 1, 1], [0], [0]>} : vector<1x8x64xbf16>, vector<1x8x64xbf16>, vector<1x8x8xf32> -> vector<1x8x8xf32>
    "tpu.trace_stop"() : () -> ()
    %cst_15 = arith.constant dense<0xFF800000> : vector<1x8xf32>
    %41 = vector.multi_reduction <maximumf>, %40, %cst_15 [2] : vector<1x8x8xf32> to vector<1x8xf32>
    %42 = vector.shape_cast %41 : vector<1x8xf32> to vector<1x8x1xf32>
    %43 = vector.broadcast %42 : vector<1x8x1xf32> to vector<1x8x8xf32>
    %44 = arith.subf %40, %43 : vector<1x8x8xf32>
    %45 = math.exp %44 : vector<1x8x8xf32>
    %cst_16 = arith.constant dense<0.000000e+00> : vector<1x8xf32>
    %46 = vector.multi_reduction <add>, %45, %cst_16 [2] : vector<1x8x8xf32> to vector<1x8xf32>
    %47 = vector.shape_cast %46 : vector<1x8xf32> to vector<1x8x1xf32>
    %48 = tpu.reciprocal %47 {approx = true} : vector<1x8x1xf32> -> vector<1x8x1xf32>
    %49 = vector.broadcast %48 : vector<1x8x1xf32> to vector<1x8x8xf32>
    %50 = arith.mulf %45, %49 : vector<1x8x8xf32>
    %51 = arith.truncf %50 : vector<1x8x8xf32> to vector<1x8x8xbf16>
    "tpu.trace_start"() <{level = 10 : i32, message = "bqk,bkd->bqd"}> : () -> ()
    %cst_17 = arith.constant dense<0.000000e+00> : vector<1x8x64xf32>
    %52 = tpu.matmul %51, %39, %cst_17 {dimension_numbers = #tpu.dot_dimension_numbers<[2], [1], [1], [2], [0, 0, 0, 1, 1, 2], [0], [0]>} : vector<1x8x8xbf16>, vector<1x8x64xbf16>, vector<1x8x64xf32> -> vector<1x8x64xf32>
    "tpu.trace_stop"() : () -> ()
    %53 = vector.shape_cast %52 : vector<1x8x64xf32> to vector<8x64xf32>
    %54 = arith.truncf %53 : vector<8x64xf32> to vector<8x64xbf16>
    %c64 = arith.constant 64 : index
    %c0_18 = arith.constant 0 : index
    %55 = vector.load %arg3[%c64, %c0_18] : memref<256x32xbf16, #tpu.memory_space<vmem>>, vector<64x32xbf16>
    %cst_19 = arith.constant dense<0.000000e+00> : vector<8x32xf32>
    %56 = tpu.matmul %54, %55, %cst_19 {dimension_numbers = #tpu.dot_dimension_numbers<[1], [0], [0], [1], [0, 0, 1, 1], [], []>} : vector<8x64xbf16>, vector<64x32xbf16>, vector<8x32xf32> -> vector<8x32xf32>
    %57 = arith.addf %36, %56 : vector<8x32xf32>
    %58 = vector.extract_strided_slice %7 {offsets = [0, 0, 128], sizes = [1, 8, 64], strides = [1, 1, 1]} : vector<1x8x256xbf16> to vector<1x8x64xbf16>
    %59 = vector.extract_strided_slice %9 {offsets = [0, 0, 128], sizes = [1, 8, 64], strides = [1, 1, 1]} : vector<1x8x256xbf16> to vector<1x8x64xbf16>
    %60 = vector.extract_strided_slice %11 {offsets = [0, 0, 128], sizes = [1, 8, 64], strides = [1, 1, 1]} : vector<1x8x256xbf16> to vector<1x8x64xbf16>
    "tpu.trace_start"() <{level = 10 : i32, message = "bqd,bkd->bqk"}> : () -> ()
    %cst_20 = arith.constant dense<0.000000e+00> : vector<1x8x8xf32>
    %61 = tpu.matmul %58, %59, %cst_20 {dimension_numbers = #tpu.dot_dimension_numbers<[2], [2], [1], [1], [0, 0, 0, 1, 1, 1], [0], [0]>} : vector<1x8x64xbf16>, vector<1x8x64xbf16>, vector<1x8x8xf32> -> vector<1x8x8xf32>
    "tpu.trace_stop"() : () -> ()
    %cst_21 = arith.constant dense<0xFF800000> : vector<1x8xf32>
    %62 = vector.multi_reduction <maximumf>, %61, %cst_21 [2] : vector<1x8x8xf32> to vector<1x8xf32>
    %63 = vector.shape_cast %62 : vector<1x8xf32> to vector<1x8x1xf32>
    %64 = vector.broadcast %63 : vector<1x8x1xf32> to vector<1x8x8xf32>
    %65 = arith.subf %61, %64 : vector<1x8x8xf32>
    %66 = math.exp %65 : vector<1x8x8xf32>
    %cst_22 = arith.constant dense<0.000000e+00> : vector<1x8xf32>
    %67 = vector.multi_reduction <add>, %66, %cst_22 [2] : vector<1x8x8xf32> to vector<1x8xf32>
    %68 = vector.shape_cast %67 : vector<1x8xf32> to vector<1x8x1xf32>
    %69 = tpu.reciprocal %68 {approx = true} : vector<1x8x1xf32> -> vector<1x8x1xf32>
    %70 = vector.broadcast %69 : vector<1x8x1xf32> to vector<1x8x8xf32>
    %71 = arith.mulf %66, %70 : vector<1x8x8xf32>
    %72 = arith.truncf %71 : vector<1x8x8xf32> to vector<1x8x8xbf16>
    "tpu.trace_start"() <{level = 10 : i32, message = "bqk,bkd->bqd"}> : () -> ()
    %cst_23 = arith.constant dense<0.000000e+00> : vector<1x8x64xf32>
    %73 = tpu.matmul %72, %60, %cst_23 {dimension_numbers = #tpu.dot_dimension_numbers<[2], [1], [1], [2], [0, 0, 0, 1, 1, 2], [0], [0]>} : vector<1x8x8xbf16>, vector<1x8x64xbf16>, vector<1x8x64xf32> -> vector<1x8x64xf32>
    "tpu.trace_stop"() : () -> ()
    %74 = vector.shape_cast %73 : vector<1x8x64xf32> to vector<8x64xf32>
    %75 = arith.truncf %74 : vector<8x64xf32> to vector<8x64xbf16>
    %c128 = arith.constant 128 : index
    %c0_24 = arith.constant 0 : index
    %76 = vector.load %arg3[%c128, %c0_24] : memref<256x32xbf16, #tpu.memory_space<vmem>>, vector<64x32xbf16>
    %cst_25 = arith.constant dense<0.000000e+00> : vector<8x32xf32>
    %77 = tpu.matmul %75, %76, %cst_25 {dimension_numbers = #tpu.dot_dimension_numbers<[1], [0], [0], [1], [0, 0, 1, 1], [], []>} : vector<8x64xbf16>, vector<64x32xbf16>, vector<8x32xf32> -> vector<8x32xf32>
    %78 = arith.addf %57, %77 : vector<8x32xf32>
    %79 = vector.extract_strided_slice %7 {offsets = [0, 0, 192], sizes = [1, 8, 64], strides = [1, 1, 1]} : vector<1x8x256xbf16> to vector<1x8x64xbf16>
    %80 = vector.extract_strided_slice %9 {offsets = [0, 0, 192], sizes = [1, 8, 64], strides = [1, 1, 1]} : vector<1x8x256xbf16> to vector<1x8x64xbf16>
    %81 = vector.extract_strided_slice %11 {offsets = [0, 0, 192], sizes = [1, 8, 64], strides = [1, 1, 1]} : vector<1x8x256xbf16> to vector<1x8x64xbf16>
    "tpu.trace_start"() <{level = 10 : i32, message = "bqd,bkd->bqk"}> : () -> ()
    %cst_26 = arith.constant dense<0.000000e+00> : vector<1x8x8xf32>
    %82 = tpu.matmul %79, %80, %cst_26 {dimension_numbers = #tpu.dot_dimension_numbers<[2], [2], [1], [1], [0, 0, 0, 1, 1, 1], [0], [0]>} : vector<1x8x64xbf16>, vector<1x8x64xbf16>, vector<1x8x8xf32> -> vector<1x8x8xf32>
    "tpu.trace_stop"() : () -> ()
    %cst_27 = arith.constant dense<0xFF800000> : vector<1x8xf32>
    %83 = vector.multi_reduction <maximumf>, %82, %cst_27 [2] : vector<1x8x8xf32> to vector<1x8xf32>
    %84 = vector.shape_cast %83 : vector<1x8xf32> to vector<1x8x1xf32>
    %85 = vector.broadcast %84 : vector<1x8x1xf32> to vector<1x8x8xf32>
    %86 = arith.subf %82, %85 : vector<1x8x8xf32>
    %87 = math.exp %86 : vector<1x8x8xf32>
    %cst_28 = arith.constant dense<0.000000e+00> : vector<1x8xf32>
    %88 = vector.multi_reduction <add>, %87, %cst_28 [2] : vector<1x8x8xf32> to vector<1x8xf32>
    %89 = vector.shape_cast %88 : vector<1x8xf32> to vector<1x8x1xf32>
    %90 = tpu.reciprocal %89 {approx = true} : vector<1x8x1xf32> -> vector<1x8x1xf32>
    %91 = vector.broadcast %90 : vector<1x8x1xf32> to vector<1x8x8xf32>
    %92 = arith.mulf %87, %91 : vector<1x8x8xf32>
    %93 = arith.truncf %92 : vector<1x8x8xf32> to vector<1x8x8xbf16>
    "tpu.trace_start"() <{level = 10 : i32, message = "bqk,bkd->bqd"}> : () -> ()
    %cst_29 = arith.constant dense<0.000000e+00> : vector<1x8x64xf32>
    %94 = tpu.matmul %93, %81, %cst_29 {dimension_numbers = #tpu.dot_dimension_numbers<[2], [1], [1], [2], [0, 0, 0, 1, 1, 2], [0], [0]>} : vector<1x8x8xbf16>, vector<1x8x64xbf16>, vector<1x8x64xf32> -> vector<1x8x64xf32>
    "tpu.trace_stop"() : () -> ()
    %95 = vector.shape_cast %94 : vector<1x8x64xf32> to vector<8x64xf32>
    %96 = arith.truncf %95 : vector<8x64xf32> to vector<8x64xbf16>
    %c192 = arith.constant 192 : index
    %c0_30 = arith.constant 0 : index
    %97 = vector.load %arg3[%c192, %c0_30] : memref<256x32xbf16, #tpu.memory_space<vmem>>, vector<64x32xbf16>
    %cst_31 = arith.constant dense<0.000000e+00> : vector<8x32xf32>
    %98 = tpu.matmul %96, %97, %cst_31 {dimension_numbers = #tpu.dot_dimension_numbers<[1], [0], [0], [1], [0, 0, 1, 1], [], []>} : vector<8x64xbf16>, vector<64x32xbf16>, vector<8x32xf32> -> vector<8x32xf32>
    %99 = arith.addf %78, %98 : vector<8x32xf32>
    %100 = vector.shape_cast %99 : vector<8x32xf32> to vector<1x8x32xf32>
    %c0_32 = arith.constant 0 : index
    %c0_33 = arith.constant 0 : index
    %c0_34 = arith.constant 0 : index
    %101 = vector.load %arg5[%c0_32, %c0_33, %c0_34] : memref<1x8x32xf32, #tpu.memory_space<vmem>>, vector<1x8x32xf32>
    tpu.vector_store %arg5[%c0_32, %c0_33, %c0_34], %100 {strides = array<i32>} : memref<1x8x32xf32, #tpu.memory_space<vmem>>, vector<1x8x32xf32>,
    return
  }
  func.func @transform_0(%arg0: i32) -> (i32, i32, i32) {
    %c0_i32 = arith.constant 0 : i32
    %c0_i32_0 = arith.constant 0 : i32
    %c0_i32_1 = arith.constant 0 : i32
    return %arg0, %c0_i32, %c0_i32_0 : i32, i32, i32
  }
  func.func @transform_1(%arg0: i32) -> (i32, i32) {
    %c0_i32 = arith.constant 0 : i32
    %c0_i32_0 = arith.constant 0 : i32
    %c0_i32_1 = arith.constant 0 : i32
    return %c0_i32, %c0_i32_0 : i32, i32
  }
  func.func @transform_2(%arg0: i32) -> (i32, i32) {
    %c0_i32 = arith.constant 0 : i32
    %c0_i32_0 = arith.constant 0 : i32
    %c0_i32_1 = arith.constant 0 : i32
    return %c0_i32, %c0_i32_0 : i32, i32
  }
  func.func @transform_3(%arg0: i32) -> (i32, i32) {
    %c0_i32 = arith.constant 0 : i32
    %c0_i32_0 = arith.constant 0 : i32
    %c0_i32_1 = arith.constant 0 : i32
    return %c0_i32, %c0_i32_0 : i32, i32
  }
  func.func @transform_4(%arg0: i32) -> (i32, i32, i32) {
    %c0_i32 = arith.constant 0 : i32
    %c0_i32_0 = arith.constant 0 : i32
    %c0_i32_1 = arith.constant 0 : i32
    return %arg0, %c0_i32, %c0_i32_0 : i32, i32, i32
  }
}

</mosaic_0001>

<bundles_post_ra>
// kernel: tpu_custom_call.1
= control target key start
LH: loop header
LB: loop body
LE: loop exit
PB: predicated region body
PF: predicated region fallthrough
CT: control target
= control target key end

     0   :  { %9 = vsyncpa [#allocation3], 0  ;;  %s1903_s0 = inlined_call_operand.vmem [shape: f32[2,8,32], index: 0, kind: input, shape index: {}]   ;;  %s1904_s1 = inlined_call_operand.vmem [shape: bf16[32,768], index: 1, kind: input, shape index: {}]   ;;  %s1905_s2 = inlined_call_operand.vmem [shape: bf16[256,32], index: 2, kind: input, shape index: {}]   ;;  %s1906_s3 = inlined_call_operand.vmem [shape: f32[1,32], index: 3, kind: input, shape index: {}]   ;;  %s1907_s4 = inlined_call_operand.hbm [shape: f32[2,8,32], index: 4, kind: output, shape index: {}]  }
   0x1   :  { %11 = vsyncpa [#allocation3 + $0x1], 0  ;;  %s1614_s15 = smov 0   ;;  %s1616_s16 = smov 0  }
   0x2   :  { %s1618_s17 = smov 0   ;;  %s1620_s18 = smov 0  }
   0x3 LB: > { %s1635_s19 = sadd.s32 4294967295, %s1582_s18   ;;  %s1228_s20 = sadd.s32 4294967294, %s1582_s18   ;;  %s1582_s18 = sphi %s1620_s18, %s1913_s18   ;;  %s1578_s17 = sphi %s1618_s17, %s1912_s17   ;;  %s1574_s16 = sphi %s1616_s16, %s1911_s16   ;;  %s1570_s15 = sphi %s1614_s15, %s1910_s15  }
   0x4   : > { %s1639_s21 = sadd.s32 1, %s1582_s18   ;;  %s113_s22 = sadd.s32 1, %s1578_s17 }
   0x5   : > { %s110_s23 = ssub.s32 %s1582_s18, %s1639_s21  ;;  %p123_p0 = scmp.ne.s32.totalorder %s1578_s17, %s1574_s16 }
   0x6   : > { %p111_p1 = scmp.eq.s32.totalorder %s110_s23, 0  ;;  %p124_p2 = scmp.eq.s32.totalorder %s1635_s19, 1 }
   0x7   : > { %p129_p3 = scmp.ne.s32.totalorder %s1574_s16, %s1570_s15  ;;  %p130_p4 = scmp.eq.s32.totalorder %s1228_s20, 1 }
   0x8   : > { %s1650_s24 = scalar_select %p111_p1, %s1578_s17, %s113_s22  }
   0x9   : > { %p1652_p5 = por %p124_p2, %p123_p0  ;;  %p1656_p6 = por %p130_p4, %p129_p3 }
   0xa   : > { %p1231_p7 = scmp.ge.s32.totalorder %s1582_s18, 1  ;;  %p164_p8 = scmp.lt.s32.totalorder %s1582_s18, 3 }
   0xc   : > { %p165_p9 = pnand %p1231_p7, %p164_p8 }
   0xd   : > { %v1470_v0 = vld [vmem:[%s1904_s1 + $0xc] ss:$24 sps:$4 sm:$0xff] (!%p165_p9)   ;;  %p189_p10 = scmp.lt.s32.totalorder (!%p165_p9), %s1635_s19, 1  ;;  %v1472_v1 = vld [vmem:[%s1904_s1 + $0x8] ss:$24 sps:$4 sm:$0xff] (!%p165_p9)   ;;  %v1584_v2 = vmov (!%p165_p9), 0  }
   0xe   : > { %168 = sbr.rel (%p165_p9) target bundleno = 2828 (0xb0c), region = 36  ;;  %345 = vmatprep.mubr.bf16.mxu1 (!%p165_p9), %v1584_v2  ;;  %304 = vmatprep.mubr.bf16.mxu0 (!%p165_p9), %v1584_v2  ;;  %v1473_v3 = vld [vmem:[%s1904_s1 + $0x3c] ss:$24 sps:$4 sm:$0xff] (!%p165_p9)   ;;  %v1475_v4 = vld [vmem:[%s1904_s1 + $0x38] ss:$24 sps:$4 sm:$0xff] (!%p165_p9)   ;;  %vm268_vm0 = vcmask (!%p165_p9), 261120  }
   0xf   : > { %313 = vmatprep.subr.bf16.mxu1 (!%p165_p9), %v1470_v0  ;;  %v1476_v5 = vld [vmem:[%s1904_s1 + $0x4] ss:$24 sps:$4 sm:$0xff] (!%p165_p9)   ;;  %v1478_v6 = vld [vmem:[%s1904_s1] ss:$24 sps:$4 sm:$0xff] (!%p165_p9)   ;;  %v1479_v7 = vld [vmem:[%s1904_s1 + $0x34] ss:$24 sps:$4 sm:$0xff] (!%p165_p9)  }
  0x10   : > { %314 = vmatpush1.bf16.msra.mxu1 (!%p165_p9), %v1472_v1  ;;  %272 = vmatprep.subr.bf16.mxu0 (!%p165_p9), %v1476_v5  ;;  %v1481_v8 = vld [vmem:[%s1904_s1 + $0x30] ss:$24 sps:$4 sm:$0xff] (!%p165_p9)   ;;  %v1585_v11 = vmov (!%p165_p9), 0.0   ;;  %vm1586_vm1 = vmmov (!%p165_p9), 0   ;;  %vm409_vm2 = vcmask (!%p165_p9), 523264   ;;  %s1587_s5 = smov (!%p165_p9), 64  }
  0x11   : > { %315 = vmatprep.subr.bf16.mxu1 (!%p165_p9), %v1473_v3  ;;  %273 = vmatpush1.bf16.msra.mxu0 (!%p165_p9), %v1478_v6  ;;  %v1482_v23 = vld [vmem:[%s1904_s1 + $0x10] ss:$24 sps:$4 sm:$0xff] (!%p165_p9)   ;;  %v1484_v24 = vld [vmem:[%s1904_s1 + $0x14] ss:$24 sps:$4 sm:$0xff] (!%p165_p9)   ;;  %v1487_v25 = vld [vmem:[%s1904_s1 + $0x44] ss:$24 sps:$4 sm:$0xff] (!%p165_p9)  }
  0x12   : > { %274 = vmatprep.subr.bf16.mxu0 (!%p165_p9), %v1479_v7  ;;  %v1485_v26 = vld [vmem:[%s1904_s1 + $0x40] ss:$24 sps:$4 sm:$0xff] (!%p165_p9)   ;;  %vm456_vm3 = vcmask (!%p165_p9), 64512   ;;  %vm472_vm4 = vcmask (!%p165_p9), 1043456   ;;  %v1489_v44 = vld [vmem:[%s1905_s2 + $0x8] sm:$0xff] (!%p165_p9)   ;;  %v1490_v45 = vld [vmem:[%s1905_s2 + $0x10] sm:$0xff] (!%p165_p9)  }
  0x13   : > { %v1488_v43 = vld [vmem:[%s1905_s2] sm:$0xff] (!%p165_p9)   ;;  %v1491_v53 = vld [vmem:[%s1905_s2 + $0x18] sm:$0xff] (!%p165_p9)   ;;  %s186_s13 = sand.u32 (!%p165_p9), 1, %s1574_s16   ;;  %s1279_s23 = sshll.u32 (!%p165_p9), %s1635_s19, 7 }
  0x14   : > { %316 = vmatpush1.bf16.msra.mxu1 (!%p165_p9), %v1475_v4  ;;  %v1492_v7 = vld [vmem:[%s1905_s2 + $0x20] sm:$0xff] (!%p165_p9)   ;;  %s1860_s6 = scalar_lea.hbm (!%p165_p9), %s1907_s4, %s1279_s23  ;;  %s1588_s8 = smov (!%p165_p9), [#allocation2]  }
  0x15   : > { %s190_s9 = scalar_select %p189_p10, %s1635_s19, 1  ;;  %275 = vmatpush1.bf16.msra.mxu0 %v1481_v8  ;;  %1318 = vmatprep.subr.bf16.mxu1 %v1585_v11  ;;  %v1493_v8 = vld [vmem:[%s1905_s2 + $0x28] sm:$0xff]  }
  0x16   : > { %354 = vmatprep.subr.bf16.mxu0 %v1484_v24  ;;  %s1156_s19 = scalar_lea.sflag [#allocation3], %s186_s13 }
  0x17   : > { %s1233_s14 = sshll.u32 %s190_s9, 3  ;;  %s1524_s9 = sshll.u32 %s1588_s8, 4  ;;  %s1525_s9 = int_to_ptr.vmem [resolvable:$false] %s1524_s9 }
  0x18   : > { %s192_s28 = scalar_lea.vmem %s1903_s0, %s1233_s14  ;;  %s1232_s14 = sshll.u32 %s186_s13, 3 }
  0x19   : > { %v194_v9 = vld [vmem:[%s192_s28] sm:$0xff]  ;;  %s188_s27 = scalar_lea.vmem [#allocation2], %s1232_s14 }
  0x1a   : > { %v195_v10 = vpack.c.bf16 %v194_v9, %v194_v9  ;;  %v1494_v9 = vld [vmem:[%s1905_s2 + $0x30] sm:$0xff]   ;;  %s1169_s28 = sshll.u32 %s188_s27, 4  ;;  %s1862_s28 = int_to_ptr.vmem [resolvable:$true] %s1169_s28 }
  0x1b   : > { %s1520_s7 = scalar_lea.vmem %s1862_s28, 128  ;;  %p1527_p0 = scmp.lt.s32.totalorder %s1862_s28, %s1525_s9 }
  0x1c   : > { %1247 = vmatmul.mubr.msk.bf16.vlgmr.msra.gmra.mrb[0].mxu1 %vm268_vm0, %v195_v10  ;;  %1246 = vmatmul.mubr.msk.bf16.vlgmr.msra.gmra.mrb[0].mxu0 %vm268_vm0, %v195_v10  ;;  %p1521_p11 = scmp.ne.s32.totalorder %s1862_s28, %s1520_s7 }
  0x1d   : > { %386 = vmatprep.mubr.bf16.mxu0 %v1584_v2  ;;  %1320 = vmatprep.mubr.msk.bf16.mxu1 %vm1586_vm1, %v1585_v11 }
  0x1e   : > { %355 = vmatpush1.bf16.msra.mxu0 %v1482_v23  ;;  %p1522_p12 = pnand %p1521_p11, %p1652_p5 }
  0x1f   : > { %356 = vmatprep.subr.bf16.mxu0 %v1487_v25 }
  0x20   : > { %p1523_p13 = pneg %p1522_p12 }
  0x22   : > { %357 = vmatpush1.bf16.msra.mxu0 %v1485_v26 }
  0x23   : > { %1324 = vmatprep.subr.bf16.mxu0 %v1585_v11 }
  0x25   : > { %1248 = vmatmul.mubr.msk.bf16.vlgmr.msra.gmra.mrb[4].mxu0 %vm268_vm0, %v195_v10 }
  0x26   : > { %1326 = vmatprep.mubr.msk.bf16.mxu0 %vm1586_vm1, %v1585_v11 }
  0xef   : > { %v347_v12 = vpop.f32.mrb[0].mxu1  ;;  %v306_v18 = vpop.f32.mrb[0].mxu0 }
  0xf0   : > { %v397_v13 = vpack.c.bf16 %v347_v12, %v347_v12  ;;  %v1696_v14 = vpop.f32.mrb[1].mxu1  ;;  %v395_v19 = vpack.c.bf16 %v306_v18, %v306_v18  ;;  %v1700_v20 = vpop.f32.mrb[1].mxu0 }
  0xf1   : > { %v351_v15 = vpop.f32.mrb[2].mxu1  ;;  %v310_v21 = vpop.f32.mrb[2].mxu0 }
  0xf2   : > { %v414_v16 = vsel %vm409_vm2, %v397_v13, 0  ;;  %597 = vrot.lane.b32.xlu1 %v397_v13, %s1587_s5  ;;  %v352_v17 = vpop.f32.mrb[3].mxu1  ;;  %v311_v22 = vpop.f32.mrb[3].mxu0  ;;  %v398_v13 = vpack.c.bf16 %v1696_v14, %v1696_v14  ;;  %v1495_v21 = vld [vmem:[%s1905_s2 + $0x38] sm:$0xff]  }
  0xf3   : > { %1319 = vmatpush3.bf16.xpose.msra.mxu1 %v414_v16 }
  0xf4   : > { %1330 = vmatprep.subr.bf16.mxu1 %v1585_v11  ;;  %v787_v17 = vsel %vm409_vm2, %v398_v13, 0 }
  0xf6   : > { %594 = vrot.lane.b32.xlu1 %v395_v19, %s1587_s5 }
  0xf8   : > { %v388_v37 = vpop.f32.mrb[4].mxu0 }
  0xf9   : > { %v1725_v38 = vpop.f32.mrb[5].mxu0  ;;  %v399_v40 = vpack.c.bf16 %v388_v37, %v388_v37  ;;  %v1497_v37 = vld [vmem:[%s1905_s2 + $0x48] sm:$0xff]  }
  0xfa   : > { %1321 = vmatmul.mubr.msk.bf16.vlgmr.msra.gmra.mrb[4].mxu1 %vm409_vm2, %v395_v19  ;;  %v392_v39 = vpop.f32.mrb[6].mxu0  ;;  %v1782_v18 = vpack.c.bf16 %v1725_v38, %v1725_v38  ;;  %v396_v19 = vpack.c.bf16 %v1700_v20, %v1700_v20  ;;  %v1498_v38 = vld [vmem:[%s1905_s2 + $0x50] sm:$0xff]  }
  0xfb   : > { %1338 = vmatprep.mubr.msk.bf16.mxu1 %vm1586_vm1, %v1585_v11  ;;  %v393_v41 = vpop.f32.mrb[7].mxu0  ;;  %v474_v42 = vsel %vm472_vm4, %v399_v40, 0  ;;  %1331 = vmatpush3.bf16.msra.mxu1 %v1488_v43 }
  0xfc   : > { %1325 = vmatpush3.bf16.msra.mxu0 %v474_v42  ;;  %1332 = vmatprep.subr.bf16.mxu1 %v1585_v11  ;;  %v845_v14 = vsel %vm472_vm4, %v1782_v18, 0 }
  0xfd   : > { %1342 = vmatprep.subr.bf16.mxu0 %v1585_v11 }
  0xff   : > { %1333 = vmatpush3.bf16.msra.mxu1 %v1489_v44 }
 0x100   : > { %1334 = vmatprep.subr.bf16.mxu1 %v1585_v11 }
 0x103   : > { %1335 = vmatpush3.bf16.msra.mxu1 %v1490_v45 }
 0x104   : > { %1336 = vmatprep.subr.bf16.mxu1 %v1585_v11 }
 0x107   : > { %1337 = vmatpush3.bf16.msra.mxu1 %v1491_v53 }
 0x108   : > { %1354 = vmatprep.subr.bf16.mxu1 %v1585_v11 }
 0x164   : > { %v598_v49 = vpop.permute.xlu1 %597 }
 0x165   : > { %v603_v51 = vsel %vm409_vm2, %v598_v49, 0 }
 0x168   : > { %v595_v52 = vpop.permute.xlu1 %594 }
 0x1cd   : > { %v450_v27 = vpop.f32.mrb[4].mxu1 }
 0x1ce   : > { %v1322_v28 = vpop.f32.mrb[5].mxu1  ;;  %v457_v29 = vsel %vm456_vm3, %v450_v27, -inf }
 0x1cf   : > { %458 = vmax.xlane.f32.xlu0 %v457_v29  ;;  %v453_v30 = vpop.f32.mrb[6].mxu1 }
 0x1d0   : > { %v1323_v31 = vpop.f32.mrb[7].mxu1 }
 0x25c   : > { %v459_v32 = vpop.xlane.xlu0 %458 }
 0x25d   : > { %v460_v33 = vsub.f32 %v450_v27, %v459_v32 }
 0x25f   : > { %v461_v34 = vmul.f32 1.442695, %v460_v33 }
 0x261   : > { %1504 = vpow2.f32 %v461_v34 }
 0x26b   : > { %v1505_v35 = vpop.eup %1504 }
 0x26c   : > { %v463_v36 = vsel %vm456_vm3, %v1505_v35, 0.0 }
 0x26d   : > { %464 = vadd.xlane.f32.xlu0 %v463_v36  ;;  %v1496_v36 = vld [vmem:[%s1905_s2 + $0x40] sm:$0xff]  }
 0x2fa   : > { %v465_v46 = vpop.xlane.xlu0 %464 }
 0x2fb   : > { %1506 = vrcp.f32 %v465_v46  ;;  %v1499_v46 = vld [vmem:[%s1905_s2 + $0x58] sm:$0xff]  }
 0x305   : > { %v1507_v47 = vpop.eup %1506 }
 0x306   : > { %v467_v48 = vmul.f32 %v1507_v47, %v1505_v35 }
 0x308   : > { %v468_v50 = vpack.c.bf16 %v467_v48, %v467_v48 }
 0x30a   : > { %1327 = vmatmul.mubr.msk.bf16.vlgmr.msra.gmra.mrb[8].mxu0 %vm456_vm3, %v468_v50 }
 0x30b   : > { %1343 = vmatpush3.bf16.xpose.msra.mxu0 %v603_v51  ;;  %1344 = vmatprep.mubr.msk.bf16.mxu0 %vm1586_vm1, %v1585_v11 }
 0x30c   : > { %1348 = vmatprep.subr.bf16.mxu0 %v1585_v11 }
 0x312   : > { %1345 = vmatmul.mubr.msk.bf16.vlgmr.msra.gmra.mrb[12].mxu0 %vm409_vm2, %v595_v52 }
 0x313   : > { %1350 = vmatprep.mubr.msk.bf16.mxu0 %vm1586_vm1, %v1585_v11 }
 0x3dd   : > { %v510_v54 = vpop.f32.mrb[8].mxu0 }
 0x3de   : > { %v516_v55 = vpack.c.bf16 %v510_v54, %v510_v54  ;;  %v1328_v56 = vpop.f32.mrb[9].mxu0 }
 0x3df   : > { %v513_v57 = vpop.f32.mrb[10].mxu0 }
 0x3e0   : > { %v1329_v58 = vpop.f32.mrb[11].mxu0  ;;  %1339 = vmatmul.mubr.msk.bf16.vlgmr.msra.gmra.mrb[8].mxu1 %vm409_vm2, %v516_v55 }
 0x3e1   : > { %1362 = vmatprep.mubr.msk.bf16.mxu1 %vm1586_vm1, %v1585_v11  ;;  %1355 = vmatpush3.bf16.msra.mxu1 %v1492_v7  ;;  %v1503_v7 = vld [vmem:[%s1905_s2 + $0x78] sm:$0xff]  }
 0x3e2   : > { %1356 = vmatprep.subr.bf16.mxu1 %v1585_v11 }
 0x3e5   : > { %v639_v59 = vpop.f32.mrb[12].mxu0  ;;  %1357 = vmatpush3.bf16.msra.mxu1 %v1493_v8 }
 0x3e6   : > { %v1346_v60 = vpop.f32.mrb[13].mxu0  ;;  %v645_v61 = vsel %vm456_vm3, %v639_v59, -inf  ;;  %1358 = vmatprep.subr.bf16.mxu1 %v1585_v11 }
 0x3e7   : > { %646 = vmax.xlane.f32.xlu0 %v645_v61  ;;  %v642_v62 = vpop.f32.mrb[14].mxu0 }
 0x3e8   : > { %v1347_v63 = vpop.f32.mrb[15].mxu0 }
 0x3e9   : > { %1359 = vmatpush3.bf16.msra.mxu1 %v1494_v9 }
 0x3ea   : > { %1360 = vmatprep.subr.bf16.mxu1 %v1585_v11 }
 0x3ed   : > { %1361 = vmatpush3.bf16.msra.mxu1 %v1495_v21 }
 0x3ee   : > { %1378 = vmatprep.subr.bf16.mxu1 %v1585_v11 }
 0x3fd   : > { %658 = vrot.lane.b32.xlu0 %v399_v40, %s1587_s5 }
 0x474   : > { %v647_v0 = vpop.xlane.xlu0 %646 }
 0x475   : > { %v648_v1 = vsub.f32 %v639_v59, %v647_v0  ;;  %v1500_v0 = vld [vmem:[%s1905_s2 + $0x60] sm:$0xff]  }
 0x477   : > { %v649_v2 = vmul.f32 1.442695, %v648_v1  ;;  %v1501_v1 = vld [vmem:[%s1905_s2 + $0x68] sm:$0xff]  }
 0x478   : > { %v659_v3 = vpop.permute.xlu0 %658 }
 0x479   : > { %1508 = vpow2.f32 %v649_v2  ;;  %v664_v4 = vsel %vm472_vm4, %v659_v3, 0  ;;  %v1502_v2 = vld [vmem:[%s1905_s2 + $0x70] sm:$0xff]  }
 0x47a   : > { %1349 = vmatpush3.bf16.msra.mxu0 %v664_v4 }
 0x47b   : > { %1366 = vmatprep.subr.bf16.mxu0 %v1585_v11 }
 0x483   : > { %v1509_v5 = vpop.eup %1508 }
 0x484   : > { %v651_v6 = vsel %vm456_vm3, %v1509_v5, 0.0 }
 0x485   : > { %652 = vadd.xlane.f32.xlu1 %v651_v6 }
 0x512   : > { %v653_v10 = vpop.xlane.xlu1 %652 }
 0x513   : > { %1510 = vrcp.f32 %v653_v10 }
 0x51d   : > { %v1511_v12 = vpop.eup %1510 }
 0x51e   : > { %v655_v15 = vmul.f32 %v1511_v12, %v1509_v5 }
 0x520   : > { %v656_v16 = vpack.c.bf16 %v655_v15, %v655_v15 }
 0x522   : > { %1351 = vmatmul.mubr.msk.bf16.vlgmr.msra.gmra.mrb[16].mxu0 %vm456_vm3, %v656_v16 }
 0x523   : > { %1367 = vmatpush3.bf16.xpose.msra.mxu0 %v787_v17  ;;  %1368 = vmatprep.mubr.msk.bf16.mxu0 %vm1586_vm1, %v1585_v11 }
 0x524   : > { %1372 = vmatprep.subr.bf16.mxu0 %v1585_v11 }
 0x52a   : > { %1369 = vmatmul.mubr.msk.bf16.vlgmr.msra.gmra.mrb[20].mxu0 %vm409_vm2, %v396_v19 }
 0x52b   : > { %1373 = vmatpush3.bf16.msra.mxu0 %v845_v14  ;;  %1374 = vmatprep.mubr.msk.bf16.mxu0 %vm1586_vm1, %v1585_v11 }
 0x52c   : > { %1390 = vmatprep.subr.bf16.mxu0 %v1585_v11 }
 0x5f5   : > { %v700_v22 = vpop.f32.mrb[16].mxu0 }
 0x5f6   : > { %v706_v20 = vpack.c.bf16 %v700_v22, %v700_v22  ;;  %v1352_v23 = vpop.f32.mrb[17].mxu0 }
 0x5f7   : > { %v703_v24 = vpop.f32.mrb[18].mxu0 }
 0x5f8   : > { %v1353_v25 = vpop.f32.mrb[19].mxu0  ;;  %1363 = vmatmul.mubr.msk.bf16.vlgmr.msra.gmra.mrb[8].mxu1 %vm409_vm2, %v706_v20 }
 0x5f9   : > { %1386 = vmatprep.mubr.msk.bf16.mxu1 %vm1586_vm1, %v1585_v11  ;;  %1379 = vmatpush3.bf16.msra.mxu1 %v1496_v36 }
 0x5fa   : > { %1380 = vmatprep.subr.bf16.mxu1 %v1585_v11 }
 0x5fd   : > { %v823_v26 = vpop.f32.mrb[20].mxu0  ;;  %1381 = vmatpush3.bf16.msra.mxu1 %v1497_v37 }
 0x5fe   : > { %v1370_v27 = vpop.f32.mrb[21].mxu0  ;;  %v829_v28 = vsel %vm456_vm3, %v823_v26, -inf  ;;  %1382 = vmatprep.subr.bf16.mxu1 %v1585_v11 }
 0x5ff   : > { %830 = vmax.xlane.f32.xlu0 %v829_v28  ;;  %v826_v29 = vpop.f32.mrb[22].mxu0 }
 0x600   : > { %v1371_v30 = vpop.f32.mrb[23].mxu0 }
 0x601   : > { %1383 = vmatpush3.bf16.msra.mxu1 %v1498_v38 }
 0x602   : > { %1384 = vmatprep.subr.bf16.mxu1 %v1585_v11 }
 0x605   : > { %1385 = vmatpush3.bf16.msra.mxu1 %v1499_v46 }
 0x606   : > { %1402 = vmatprep.subr.bf16.mxu1 %v1585_v11 }
 0x615   : > { %965 = vrot.lane.b32.xlu0 %v396_v19, %s1587_s5 }
 0x68c   : > { %v831_v31 = vpop.xlane.xlu0 %830 }
 0x68d   : > { %v832_v32 = vsub.f32 %v823_v26, %v831_v31 }
 0x68f   : > { %v833_v33 = vmul.f32 1.442695, %v832_v32 }
 0x690   : > { %v966_v45 = vpop.permute.xlu0 %965 }
 0x691   : > { %1512 = vpow2.f32 %v833_v33 }
 0x69b   : > { %v1513_v34 = vpop.eup %1512 }
 0x69c   : > { %v835_v35 = vsel %vm456_vm3, %v1513_v34, 0.0 }
 0x69d   : > { %836 = vadd.xlane.f32.xlu1 %v835_v35 }
 0x6ae   : > { %968 = vrot.lane.b32.xlu1 %v398_v13, %s1587_s5 }
 0x72a   : > { %v837_v39 = vpop.xlane.xlu1 %836 }
 0x72b   : > { %1514 = vrcp.f32 %v837_v39 }
 0x72e   : > { %v969_v42 = vpop.permute.xlu1 %968 }
 0x72f   : > { %v974_v44 = vsel %vm409_vm2, %v969_v42, 0 }
 0x735   : > { %v1515_v40 = vpop.eup %1514 }
 0x736   : > { %v839_v41 = vmul.f32 %v1515_v40, %v1513_v34 }
 0x738   : > { %v840_v43 = vpack.c.bf16 %v839_v41, %v839_v41 }
 0x73a   : > { %1375 = vmatmul.mubr.msk.bf16.vlgmr.msra.gmra.mrb[24].mxu0 %vm456_vm3, %v840_v43 }
 0x73b   : > { %1391 = vmatpush3.bf16.xpose.msra.mxu0 %v974_v44  ;;  %1392 = vmatprep.mubr.msk.bf16.mxu0 %vm1586_vm1, %v1585_v11 }
 0x73c   : > { %1396 = vmatprep.subr.bf16.mxu0 %v1585_v11 }
 0x742   : > { %1393 = vmatmul.mubr.msk.bf16.vlgmr.msra.gmra.mrb[28].mxu0 %vm409_vm2, %v966_v45 }
 0x743   : > { %1398 = vmatprep.mubr.msk.bf16.mxu0 %vm1586_vm1, %v1585_v11 }
 0x80d   : > { %v881_v47 = vpop.f32.mrb[24].mxu0 }
 0x80e   : > { %v887_v48 = vpack.c.bf16 %v881_v47, %v881_v47  ;;  %v1376_v49 = vpop.f32.mrb[25].mxu0 }
 0x80f   : > { %v884_v50 = vpop.f32.mrb[26].mxu0 }
 0x810   : > { %v1377_v51 = vpop.f32.mrb[27].mxu0  ;;  %1387 = vmatmul.mubr.msk.bf16.vlgmr.msra.gmra.mrb[8].mxu1 %vm409_vm2, %v887_v48 }
 0x811   : > { %1410 = vmatprep.mubr.msk.bf16.mxu1 %vm1586_vm1, %v1585_v11  ;;  %1403 = vmatpush3.bf16.msra.mxu1 %v1500_v0 }
 0x812   : > { %1404 = vmatprep.subr.bf16.mxu1 %v1585_v11 }
 0x815   : > { %v1010_v52 = vpop.f32.mrb[28].mxu0  ;;  %1405 = vmatpush3.bf16.msra.mxu1 %v1501_v1 }
 0x816   : > { %v1394_v53 = vpop.f32.mrb[29].mxu0  ;;  %v1016_v54 = vsel %vm456_vm3, %v1010_v52, -inf  ;;  %1406 = vmatprep.subr.bf16.mxu1 %v1585_v11 }
 0x817   : > { %1017 = vmax.xlane.f32.xlu1 %v1016_v54  ;;  %v1013_v55 = vpop.f32.mrb[30].mxu0 }
 0x818   : > { %v1395_v56 = vpop.f32.mrb[31].mxu0 }
 0x819   : > { %1407 = vmatpush3.bf16.msra.mxu1 %v1502_v2 }
 0x81a   : > { %1408 = vmatprep.subr.bf16.mxu1 %v1585_v11  ;;  %v1249_v11 = vld [vmem:[%s1906_s3] ss:$0 sm:$0xff] }
 0x81d   : > { %1409 = vmatpush3.bf16.msra.mxu1 %v1503_v7 }
 0x828   : > { %1029 = vrot.lane.b32.xlu1 %v1782_v18, %s1587_s5  ;;  %s1526_s5 = scalar_lea.vmem %s1525_s9, 256 }
 0x829   : > { %p1528_p1 = scmp.lt.s32.totalorder %s1526_s5, %s1520_s7 }
 0x82b   : > { %p1529_p2 = por %p1528_p1, %p1527_p0 }
 0x82d   : > { %p1530_p3 = pnand %p1529_p2, %p1523_p13 }
 0x8a4   : > { %v1018_v57 = vpop.xlane.xlu1 %1017 }
 0x8a5   : > { %v1019_v58 = vsub.f32 %v1010_v52, %v1018_v57 }
 0x8a7   : > { %v1020_v59 = vmul.f32 1.442695, %v1019_v58 }
 0x8a8   : > { %v1030_v60 = vpop.permute.xlu1 %1029 }
 0x8a9   : > { %1516 = vpow2.f32 %v1020_v59  ;;  %v1035_v61 = vsel %vm472_vm4, %v1030_v60, 0 }
 0x8aa   : > { %1397 = vmatpush3.bf16.msra.mxu0 %v1035_v61 }
 0x8b3   : > { %v1517_v62 = vpop.eup %1516 }
 0x8b4   : > { %v1022_v63 = vsel %vm456_vm3, %v1517_v62, 0.0 }
 0x8b5   : > { %1023 = vadd.xlane.f32.xlu0 %v1022_v63 }
 0x942   : > { %v1024_v3 = vpop.xlane.xlu0 %1023 }
 0x943   : > { %1518 = vrcp.f32 %v1024_v3 }
 0x94d   : > { %v1519_v4 = vpop.eup %1518 }
 0x94e   : > { %v1026_v5 = vmul.f32 %v1519_v4, %v1517_v62 }
 0x950   : > { %v1027_v6 = vpack.c.bf16 %v1026_v5, %v1026_v5 }
 0x952   : > { %1399 = vmatmul.mubr.msk.bf16.vlgmr.msra.gmra.mrb[32].mxu0 %vm456_vm3, %v1027_v6 }
 0xa25   : > { %v1071_v8 = vpop.f32.mrb[32].mxu0 }
 0xa26   : > { %v1077_v9 = vpack.c.bf16 %v1071_v8, %v1071_v8  ;;  %v1400_v10 = vpop.f32.mrb[33].mxu0 }
 0xa27   : > { %v1074_v12 = vpop.f32.mrb[34].mxu0 }
 0xa28   : > { %v1401_v13 = vpop.f32.mrb[35].mxu0  ;;  %1411 = vmatmul.mubr.msk.bf16.vlgmr.msra.gmra.mrb[8].mxu1 %vm409_vm2, %v1077_v9 }
 0xafb   : > { %v1147_v15 = vpop.f32.mrb[8].mxu1 }
 0xafc   : > { %v1414_v16 = vadd.f32 %v1249_v11, %v1147_v15  ;;  %v1412_v17 = vpop.f32.mrb[9].mxu1 }
 0xafd   : > { %v1150_v18 = vpop.f32.mrb[10].mxu1 }
 0xafe   : > { %v1413_v19 = vpop.f32.mrb[11].mxu1  ;;  %1154 = vst.msk [vmem:[%s188_s27] sm:$0xff] %vm268_vm0, %v1414_v16 }
 0xaff   : > { %1533 = shalt.err (!%p1530_p3)
}
 0xb00   : > { %s1534_s10 = scalar_lea.hbm %s1860_s6, 128  ;;  %s1538_s13 = scalar_lea.hbm %s1907_s4, 256 }
 0xb01   : > { %p1535_p4 = scmp.ne.s32.totalorder %s1860_s6, %s1534_s10  ;;  %p1539_p9 = scmp.lt.u32.totalorder %s1860_s6, %s1907_s4 }
 0xb02   : > { %p1540_p10 = scmp.lt.u32.totalorder %s1538_s13, %s1534_s10  ;;  %p1542_p12 = scmp.lt.u32.totalorder %s1534_s10, %s1860_s6 }
 0xb03   : > { %p1536_p7 = pnand %p1535_p4, %p1652_p5 }
 0xb04   : > { %p1541_p11 = por %p1540_p10, %p1539_p9 }
 0xb05   : > { %p1537_p8 = pneg %p1536_p7 }
 0xb06   : > { %p1543_p13 = por %p1542_p12, %p1541_p11 }
 0xb08   : > { %p1544_p0 = pnand %p1543_p13, %p1537_p8 }
 0xb0a   : > { %1547 = shalt.err (!%p1544_p0)
}
 0xb0b   : > { %1427 = dma.vmem_to_hbm [thread:$0]  (%p1652_p5), %s1862_s28, 128, %s1860_s6, %s1156_s19  }
 0xb0c PF: > { %p1433_p1 = scmp.ge.s32.totalorder %s1582_s18, 2  ;;  %s1181_s22 = sand.u32 1, %s1570_s15  }
 0xb0d   : > { %s1182_s23 = scalar_lea.sflag [#allocation3], %s1181_s22 }
 0xb0e   : > { %p1430_p2 = pnand %p1433_p1, %p1656_p6 }
 0xb10   : > { %1565 = dma.done.wait (!%p1430_p2), %s1182_s23, 128  }
 0xb11   : > { %1567 = vsyncadd (!%p1430_p2), %s1182_s23, 4294967168  ;;  %p14_p3 = scmp.ge.s32.totalorder %s1639_s21, 4   ;;  %s1910_s15 = smov %s1574_s16 }
 0xb12   : > { %s1911_s16 = smov %s1578_s17  ;;  %s1912_s17 = smov %s1650_s24 }
 0xb13   : > { %s1913_s18 = smov %s1639_s21  ;;  %16 = sbr.rel (!%p14_p3) target bundleno = 3 (0x3), region = 71 }
 0xb1a   :  { %1187 = vsyncpa [#allocation3], 1 }
 0xb1b   :  { %1189 = vsyncpa [#allocation3 + $0x1], 1 }

</bundles_post_ra>
